<compile_context>
chip_gen: v7x
topology: tpu7x:2x2x1
jax: 0.10.0
libtpu: 0.0.40
codegen_flags: <defaults>
</compile_context>

<pallas_src>
import functools

import numpy as np
import jax
import jax.numpy as jnp
from jax.experimental import pallas as pl
from jax.experimental.pallas import tpu as pltpu

ACTION_LEN = 5
STATE_MEMORY_LEN = 8
N_CONV = 128          # vectorOutDim
N_FC = 128            # scalarOutDim
N_FC1 = 128           # numFcOutput
KSIZE = 4
T_POS = STATE_MEMORY_LEN - KSIZE + 1   # 5
C_POS = ACTION_LEN - KSIZE + 1         # 2
NUM_FC_INPUT = 2 * N_CONV * T_POS + 3 * N_FC + N_CONV * C_POS   # 1920
N_CHAN = 6
N_IN = N_CHAN * STATE_MEMORY_LEN       # 48 flattened state scalars
PAD_OUT = 128                          # lane-padded logits width


# --------------------------------------------------------------------------
# Pallas kernel: 3 MXU matmuls + bias/ReLU/softmax.
# --------------------------------------------------------------------------
def actor_kernel(x_ref, w_in_ref, b_in_ref, w_fc_ref, b_fc_ref,
                 w_out_ref, b_out_ref, o_ref):
    dot = functools.partial(jnp.dot, preferred_element_type=jnp.float32)
    # f32 -> bf16 cast in-kernel; input stays [B,48] f32 in HBM (no wrapper op).
    x = x_ref[...].astype(jnp.bfloat16)                  # [TB, 48]

    # ---- layer 1: all six branches fused into one banded matmul ----
    h1 = dot(x, w_in_ref[...]) + b_in_ref[...]           # [TB, 1920] f32
    h1 = jnp.maximum(h1, 0.0).astype(jnp.bfloat16)

    # ---- layer 2: fullyConnected(1920 -> 128), single K=1920 contraction ----
    h2 = dot(h1, w_fc_ref[...]) + b_fc_ref[...]          # [TB, 128] f32
    h2 = jnp.maximum(h2, 0.0).astype(jnp.bfloat16)

    # ---- output layer (5-way, lane-padded with -1e9 f32 bias) + softmax ----
    logits = dot(h2, w_out_ref[...]) + b_out_ref[...]    # [TB, 128] f32
    m = jnp.max(logits, axis=-1, keepdims=True)
    e = jnp.exp(logits - m)
    denom = jnp.sum(e, axis=-1, keepdims=True)
    # Exact reciprocal: rows sum to 1 (output may feed Categorical sampling).
    o_ref[...] = e / denom


# --------------------------------------------------------------------------
# Wrapper
# --------------------------------------------------------------------------
def _round_up(n, m):
    return ((n + m - 1) // m) * m


def _pick_tile(b, block_b):
    # Multiples of 16: bf16 packs 16 rows per sublane group (avoids relayouts).
    if b < 64:
        return _round_up(max(b, 1), 16)
    # >= 2 grid steps so ("parallel",) engages both v7x TensorCores; cap at
    # block_b to bound per-tile VMEM intermediates.
    return min(block_b, _round_up(-(-b // 2), 16))


def actor_forward(x, packed, *, block_b=512):
    B = x.shape[0]
    # [B, 6, 8] -> [B, 48] (channel-major, time-minor): metadata-only reshape,
    # no pad, no cast — cast is done inside the kernel.
    x_flat = x.reshape(B, N_IN)

    tb = _pick_tile(B, block_b)
    b_pad = _round_up(B, tb)
    if b_pad != B:
        x_flat = jnp.pad(x_flat, ((0, b_pad - B), (0, 0)))
    grid = (b_pad // tb,)

    args = (x_flat, packed["w_in"], packed["b_in"], packed["w_fc"],
            packed["b_fc"], packed["w_out"], packed["b_out"])

    def full_spec(a):
        return pl.BlockSpec(a.shape, lambda i: (0,) * a.ndim)

    # (tb, 48) is legal: 48 equals the full last dim of the input array.
    in_specs = [pl.BlockSpec((tb, N_IN), lambda i: (i, 0))]
    in_specs += [full_spec(a) for a in args[1:]]

    flops = 2 * b_pad * (N_IN * NUM_FC_INPUT + NUM_FC_INPUT * N_FC1
                         + N_FC1 * PAD_OUT)
    bytes_accessed = int(sum(int(np.prod(a.shape)) * a.dtype.itemsize
                             for a in args) + b_pad * PAD_OUT * 4)

    out = pl.pallas_call(
        actor_kernel,
        out_shape=jax.ShapeDtypeStruct((b_pad, PAD_OUT), jnp.float32),
        grid=grid,
        in_specs=in_specs,
        out_specs=pl.BlockSpec((tb, PAD_OUT), lambda i: (i, 0)),
        compiler_params=pltpu.CompilerParams(
            dimension_semantics=("parallel",),
            vmem_limit_bytes=48 * 1024 * 1024),   # headroom; < v7x 64 MiB phys
        cost_estimate=pl.CostEstimate(
            flops=flops,
            transcendentals=b_pad * PAD_OUT,
            bytes_accessed=bytes_accessed),
    )(*args)
    return out[:B, :ACTION_LEN]


# --------------------------------------------------------------------------
# Deterministic synthetic parameters (PyTorch shapes).
# --------------------------------------------------------------------------
def init_params(key):
    ks = jax.random.split(key, 16)

    def xavier_u(k, shape, fan_in, fan_out):
        lim = float(np.sqrt(6.0 / (fan_in + fan_out)))
        return jax.random.uniform(k, shape, jnp.float32, -lim, lim)

    p = {}
    p["W_bitrate"] = xavier_u(ks[0], (N_FC, 1), 1, N_FC)
    p["b_bitrate"] = 0.01 * jax.random.normal(ks[1], (N_FC,), jnp.float32)
    p["W_buffer"] = xavier_u(ks[2], (N_FC, 1), 1, N_FC)
    p["b_buffer"] = 0.01 * jax.random.normal(ks[3], (N_FC,), jnp.float32)
    p["W_left"] = xavier_u(ks[4], (N_FC, 1), 1, N_FC)
    p["b_left"] = 0.01 * jax.random.normal(ks[5], (N_FC,), jnp.float32)
    p["W_t"] = xavier_u(ks[6], (N_CONV, 1, KSIZE), KSIZE, N_CONV * KSIZE)
    p["b_t"] = 0.01 * jax.random.normal(ks[7], (N_CONV,), jnp.float32)
    p["W_d"] = xavier_u(ks[8], (N_CONV, 1, KSIZE), KSIZE, N_CONV * KSIZE)
    p["b_d"] = 0.01 * jax.random.normal(ks[9], (N_CONV,), jnp.float32)
    std_c = float(np.sqrt(2.0 / (KSIZE + N_CONV * KSIZE)))    # xavier_normal_
    p["W_c"] = std_c * jax.random.normal(ks[10], (N_CONV, 1, KSIZE), jnp.float32)
    p["b_c"] = 0.01 * jax.random.normal(ks[11], (N_CONV,), jnp.float32)
    p["W_fc"] = xavier_u(ks[12], (N_FC1, NUM_FC_INPUT), NUM_FC_INPUT, N_FC1)
    p["b_fc"] = 0.01 * jax.random.normal(ks[13], (N_FC1,), jnp.float32)
    lim_out = float(1.0 / np.sqrt(N_FC1))
    p["W_out"] = jax.random.uniform(ks[14], (ACTION_LEN, N_FC1), jnp.float32,
                                    -lim_out, lim_out)
    p["b_out"] = jax.random.uniform(ks[15], (ACTION_LEN,), jnp.float32,
                                    -lim_out, lim_out)
    return p


# --------------------------------------------------------------------------
# Pack parameters into the fused kernel layout (host-side numpy).
# --------------------------------------------------------------------------
def pack_params(p):
    L = STATE_MEMORY_LEN
    last = L - 1

    # ---- layer-1 fused weight/bias: [48, 1920] / [1, 1920] ----
    # rows: flattened state index ch*L + t; cols: fused feature order
    # [bitrate | buffer | t(pos-major) | d(pos-major) | c(pos-major) | left]
    W_in = np.zeros((N_IN, NUM_FC_INPUT), np.float32)
    b_in = np.zeros((NUM_FC_INPUT,), np.float32)

    off = 0
    W_in[0 * L + last, off:off + N_FC] = np.asarray(p["W_bitrate"])[:, 0]
    b_in[off:off + N_FC] = np.asarray(p["b_bitrate"]); off += N_FC
    W_in[1 * L + last, off:off + N_FC] = np.asarray(p["W_buffer"])[:, 0]
    b_in[off:off + N_FC] = np.asarray(p["b_buffer"]); off += N_FC

    conv_specs = [(2, "W_t", "b_t", T_POS),
                  (3, "W_d", "b_d", T_POS),
                  (4, "W_c", "b_c", C_POS)]
    for ch, wname, bname, n_pos in conv_specs:
        W = np.asarray(p[wname])[:, 0, :]          # [128, 4]
        b = np.asarray(p[bname])
        for pos in range(n_pos):
            for k in range(KSIZE):
                W_in[ch * L + pos + k,
                     off + pos * N_CONV: off + (pos + 1) * N_CONV] = W[:, k]
            b_in[off + pos * N_CONV: off + (pos + 1) * N_CONV] = b
        off += n_pos * N_CONV

    W_in[5 * L + last, off:off + N_FC] = np.asarray(p["W_left"])[:, 0]
    b_in[off:off + N_FC] = np.asarray(p["b_left"]); off += N_FC
    assert off == NUM_FC_INPUT

    # ---- layer-2 fused weight: [1920, 128] in kernel feature order ----
    # PyTorch flatten order of conv outputs is channel-major (c*T_POS + pos);
    # the kernel order is position-major (pos*128 + c) -> permute columns.
    Wfc = np.asarray(p["W_fc"])                    # [128, 1920] torch order
    pt_off_bit = 0
    pt_off_buf = N_FC
    pt_off_t = 2 * N_FC
    pt_off_d = pt_off_t + N_CONV * T_POS
    pt_off_c = pt_off_d + N_CONV * T_POS
    pt_off_l = pt_off_c + N_CONV * C_POS

    perm = np.empty((NUM_FC_INPUT,), np.int64)
    k_off = 0
    perm[k_off:k_off + N_FC] = np.arange(N_FC) + pt_off_bit; k_off += N_FC
    perm[k_off:k_off + N_FC] = np.arange(N_FC) + pt_off_buf; k_off += N_FC
    for pt_off, n_pos in ((pt_off_t, T_POS), (pt_off_d, T_POS), (pt_off_c, C_POS)):
        for pos in range(n_pos):
            for c_ in range(N_CONV):
                perm[k_off] = pt_off + c_ * n_pos + pos
                k_off += 1
    perm[k_off:k_off + N_FC] = np.arange(N_FC) + pt_off_l; k_off += N_FC
    assert k_off == NUM_FC_INPUT
    W_fc_big = Wfc[:, perm].T                      # [1920, 128]

    # ---- output layer, lane-padded to 128 (bias stays f32: -1e9 pad value) ----
    W_out_pad = np.zeros((N_FC1, PAD_OUT), np.float32)
    W_out_pad[:, :ACTION_LEN] = np.asarray(p["W_out"]).T
    b_out_pad = np.full((1, PAD_OUT), -1e9, np.float32)
    b_out_pad[0, :ACTION_LEN] = np.asarray(p["b_out"])

    # TODO(synk): optional b_in fold into W_in needs an extra always-one input
    # lane (re-introduces a wrapper pad op); kept as an explicit f32 bias add.
    return dict(
        w_in=jnp.asarray(W_in, jnp.bfloat16),
        b_in=jnp.asarray(b_in[None, :], jnp.float32),
        w_fc=jnp.asarray(W_fc_big, jnp.bfloat16),
        b_fc=jnp.asarray(np.asarray(p["b_fc"])[None, :], jnp.float32),
        w_out=jnp.asarray(W_out_pad, jnp.bfloat16),
        b_out=jnp.asarray(b_out_pad, jnp.float32),
    )


# --------------------------------------------------------------------------
# Pure-JAX f32 reference (mirrors the PyTorch forward exactly).
# --------------------------------------------------------------------------
def reference_forward(x, p):
    relu = lambda a: jnp.maximum(a, 0.0)
    bitrate = relu(x[:, 0, -1:] @ p["W_bitrate"].T + p["b_bitrate"])
    buffer_ = relu(x[:, 1, -1:] @ p["W_buffer"].T + p["b_buffer"])
    left = relu(x[:, 5, -1:] @ p["W_left"].T + p["b_left"])

    def conv(sig, W, b, n_pos):
        cols = [sig[:, l:l + KSIZE] @ W[:, 0, :].T for l in range(n_pos)]
        return relu(jnp.stack(cols, axis=-1) + b[None, :, None])   # [B,128,n_pos]

    t = conv(x[:, 2, :], p["W_t"], p["b_t"], T_POS)
    d = conv(x[:, 3, :], p["W_d"], p["b_d"], T_POS)
    c = conv(x[:, 4, :ACTION_LEN], p["W_c"], p["b_c"], C_POS)
    B = x.shape[0]
    fc_in = jnp.concatenate(
        [bitrate, buffer_, t.reshape(B, -1), d.reshape(B, -1),
         c.reshape(B, -1), left], 1)
    fc = relu(fc_in @ p["W_fc"].T + p["b_fc"])
    logits = fc @ p["W_out"].T + p["b_out"]
    return jax.nn.softmax(logits, axis=-1)


if __name__ == "__main__":
    key = jax.random.PRNGKey(0)
    k_x, k_p = jax.random.split(key)
    B = 4
    x = jax.random.normal(k_x, (B, N_CHAN, STATE_MEMORY_LEN), jnp.float32)

    params = init_params(k_p)
    packed = pack_params(params)

    out = actor_forward(x, packed)
    out = jax.block_until_ready(out)

    ref = reference_forward(x, params)
    assert out.shape == (B, ACTION_LEN), out.shape
    # bf16 matmuls (f32 accumulation) vs f32 reference: loose-ish tolerances.
    np.testing.assert_allclose(np.asarray(out), np.asarray(ref),
                               atol=5e-3, rtol=5e-2)
    # Exact reciprocal in the kernel -> rows sum to one up to f32 rounding.
    np.testing.assert_allclose(np.asarray(out).sum(-1), np.ones(B), atol=1e-4)
    print("KERNEL_OK")
</pallas_src>

<mosaic_0001>
module attributes {stable_mosaic.version = 11 : i64} {
  func.func @actor_kernel(%arg0: i32, %arg1: memref<16x48xf32, #tpu.memory_space<vmem>>, %arg2: memref<48x1920xbf16, #tpu.memory_space<vmem>>, %arg3: memref<1x1920xf32, #tpu.memory_space<vmem>>, %arg4: memref<1920x128xbf16, #tpu.memory_space<vmem>>, %arg5: memref<1x128xf32, #tpu.memory_space<vmem>>, %arg6: memref<128x128xbf16, #tpu.memory_space<vmem>>, %arg7: memref<1x128xf32, #tpu.memory_space<vmem>>, %arg8: memref<16x128xf32, #tpu.memory_space<vmem>>) attributes {dimension_semantics = [#tpu.dimension_semantics<parallel>], iteration_bounds = array<i64: 1>, scalar_prefetch = 0 : i64, scratch_operands = 0 : i64, tpu.core_type = #tpu.core_type<tc>, window_params = [{transform_indices = @transform_0, window_bounds = array<i64: 16, 48>}, {pipeline_mode = #tpu.pipeline_mode<synchronous>, transform_indices = @transform_1, window_bounds = array<i64: 48, 1920>}, {pipeline_mode = #tpu.pipeline_mode<synchronous>, transform_indices = @transform_2, window_bounds = array<i64: 1, 1920>}, {pipeline_mode = #tpu.pipeline_mode<synchronous>, transform_indices = @transform_3, window_bounds = array<i64: 1920, 128>}, {pipeline_mode = #tpu.pipeline_mode<synchronous>, transform_indices = @transform_4, window_bounds = array<i64: 1, 128>}, {pipeline_mode = #tpu.pipeline_mode<synchronous>, transform_indices = @transform_5, window_bounds = array<i64: 128, 128>}, {pipeline_mode = #tpu.pipeline_mode<synchronous>, transform_indices = @transform_6, window_bounds = array<i64: 1, 128>}, {transform_indices = @transform_7, window_bounds = array<i64: 16, 128>}]} {
    %c0 = arith.constant 0 : index
    %c0_0 = arith.constant 0 : index
    %0 = vector.load %arg1[%c0, %c0_0] : memref<16x48xf32, #tpu.memory_space<vmem>>, vector<16x48xf32>
    %1 = arith.truncf %0 : vector<16x48xf32> to vector<16x48xbf16>
    %c0_1 = arith.constant 0 : index
    %c0_2 = arith.constant 0 : index
    %2 = vector.load %arg2[%c0_1, %c0_2] : memref<48x1920xbf16, #tpu.memory_space<vmem>>, vector<48x1920xbf16>
    %cst = arith.constant dense<0.000000e+00> : vector<16x1920xf32>
    %3 = tpu.matmul %1, %2, %cst {dimension_numbers = #tpu.dot_dimension_numbers<[1], [0], [0], [1], [0, 0, 1, 1], [], []>} : vector<16x48xbf16>, vector<48x1920xbf16>, vector<16x1920xf32> -> vector<16x1920xf32>
    %c0_3 = arith.constant 0 : index
    %c0_4 = arith.constant 0 : index
    %4 = vector.load %arg3[%c0_3, %c0_4] : memref<1x1920xf32, #tpu.memory_space<vmem>>, vector<1x1920xf32>
    %5 = vector.broadcast %4 : vector<1x1920xf32> to vector<16x1920xf32>
    %6 = arith.addf %3, %5 : vector<16x1920xf32>
    %cst_5 = arith.constant 0.000000e+00 : f32
    %7 = vector.broadcast %cst_5 : f32 to vector<16x1920xf32>
    %8 = arith.maximumf %6, %7 : vector<16x1920xf32>
    %9 = arith.truncf %8 : vector<16x1920xf32> to vector<16x1920xbf16>
    %c0_6 = arith.constant 0 : index
    %c0_7 = arith.constant 0 : index
    %10 = vector.load %arg4[%c0_6, %c0_7] : memref<1920x128xbf16, #tpu.memory_space<vmem>>, vector<1920x128xbf16>
    %cst_8 = arith.constant dense<0.000000e+00> : vector<16x128xf32>
    %11 = tpu.matmul %9, %10, %cst_8 {dimension_numbers = #tpu.dot_dimension_numbers<[1], [0], [0], [1], [0, 0, 1, 1], [], []>} : vector<16x1920xbf16>, vector<1920x128xbf16>, vector<16x128xf32> -> vector<16x128xf32>
    %c0_9 = arith.constant 0 : index
    %c0_10 = arith.constant 0 : index
    %12 = vector.load %arg5[%c0_9, %c0_10] : memref<1x128xf32, #tpu.memory_space<vmem>>, vector<1x128xf32>
    %13 = vector.broadcast %12 : vector<1x128xf32> to vector<16x128xf32>
    %14 = arith.addf %11, %13 : vector<16x128xf32>
    %cst_11 = arith.constant 0.000000e+00 : f32
    %15 = vector.broadcast %cst_11 : f32 to vector<16x128xf32>
    %16 = arith.maximumf %14, %15 : vector<16x128xf32>
    %17 = arith.truncf %16 : vector<16x128xf32> to vector<16x128xbf16>
    %c0_12 = arith.constant 0 : index
    %c0_13 = arith.constant 0 : index
    %18 = vector.load %arg6[%c0_12, %c0_13] : memref<128x128xbf16, #tpu.memory_space<vmem>>, vector<128x128xbf16>
    %cst_14 = arith.constant dense<0.000000e+00> : vector<16x128xf32>
    %19 = tpu.matmul %17, %18, %cst_14 {dimension_numbers = #tpu.dot_dimension_numbers<[1], [0], [0], [1], [0, 0, 1, 1], [], []>} : vector<16x128xbf16>, vector<128x128xbf16>, vector<16x128xf32> -> vector<16x128xf32>
    %c0_15 = arith.constant 0 : index
    %c0_16 = arith.constant 0 : index
    %20 = vector.load %arg7[%c0_15, %c0_16] : memref<1x128xf32, #tpu.memory_space<vmem>>, vector<1x128xf32>
    %21 = vector.broadcast %20 : vector<1x128xf32> to vector<16x128xf32>
    %22 = arith.addf %19, %21 : vector<16x128xf32>
    %cst_17 = arith.constant dense<0xFF800000> : vector<16xf32>
    %23 = vector.multi_reduction <maximumf>, %22, %cst_17 [1] : vector<16x128xf32> to vector<16xf32>
    %24 = vector.shape_cast %23 : vector<16xf32> to vector<16x1xf32>
    %25 = vector.broadcast %24 : vector<16x1xf32> to vector<16x128xf32>
    %26 = arith.subf %22, %25 : vector<16x128xf32>
    %27 = math.exp %26 : vector<16x128xf32>
    %cst_18 = arith.constant dense<0.000000e+00> : vector<16xf32>
    %28 = vector.multi_reduction <add>, %27, %cst_18 [1] : vector<16x128xf32> to vector<16xf32>
    %29 = vector.shape_cast %28 : vector<16xf32> to vector<16x1xf32>
    %30 = vector.broadcast %29 : vector<16x1xf32> to vector<16x128xf32>
    %31 = arith.divf %27, %30 : vector<16x128xf32>
    %c0_19 = arith.constant 0 : index
    %c0_20 = arith.constant 0 : index
    %32 = vector.load %arg8[%c0_19, %c0_20] : memref<16x128xf32, #tpu.memory_space<vmem>>, vector<16x128xf32>
    tpu.vector_store %arg8[%c0_19, %c0_20], %31 {strides = array<i32>} : memref<16x128xf32, #tpu.memory_space<vmem>>, vector<16x128xf32>,
    return
  }
  func.func @transform_0(%arg0: i32) -> (i32, i32) {
    %c0_i32 = arith.constant 0 : i32
    %c0_i32_0 = arith.constant 0 : i32
    return %arg0, %c0_i32 : i32, i32
  }
  func.func @transform_1(%arg0: i32) -> (i32, i32) {
    %c0_i32 = arith.constant 0 : i32
    %c0_i32_0 = arith.constant 0 : i32
    %c0_i32_1 = arith.constant 0 : i32
    return %c0_i32, %c0_i32_0 : i32, i32
  }
  func.func @transform_2(%arg0: i32) -> (i32, i32) {
    %c0_i32 = arith.constant 0 : i32
    %c0_i32_0 = arith.constant 0 : i32
    %c0_i32_1 = arith.constant 0 : i32
    return %c0_i32, %c0_i32_0 : i32, i32
  }
  func.func @transform_3(%arg0: i32) -> (i32, i32) {
    %c0_i32 = arith.constant 0 : i32
    %c0_i32_0 = arith.constant 0 : i32
    %c0_i32_1 = arith.constant 0 : i32
    return %c0_i32, %c0_i32_0 : i32, i32
  }
  func.func @transform_4(%arg0: i32) -> (i32, i32) {
    %c0_i32 = arith.constant 0 : i32
    %c0_i32_0 = arith.constant 0 : i32
    %c0_i32_1 = arith.constant 0 : i32
    return %c0_i32, %c0_i32_0 : i32, i32
  }
  func.func @transform_5(%arg0: i32) -> (i32, i32) {
    %c0_i32 = arith.constant 0 : i32
    %c0_i32_0 = arith.constant 0 : i32
    %c0_i32_1 = arith.constant 0 : i32
    return %c0_i32, %c0_i32_0 : i32, i32
  }
  func.func @transform_6(%arg0: i32) -> (i32, i32) {
    %c0_i32 = arith.constant 0 : i32
    %c0_i32_0 = arith.constant 0 : i32
    %c0_i32_1 = arith.constant 0 : i32
    return %c0_i32, %c0_i32_0 : i32, i32
  }
  func.func @transform_7(%arg0: i32) -> (i32, i32) {
    %c0_i32 = arith.constant 0 : i32
    %c0_i32_0 = arith.constant 0 : i32
    return %arg0, %c0_i32 : i32, i32
  }
}

</mosaic_0001>

<bundles_post_ra>
// kernel: tpu_custom_call.1
= control target key start
LH: loop header
LB: loop body
LE: loop exit
PB: predicated region body
PF: predicated region fallthrough
CT: control target
= control target key end

     0   :  { %12 = vsyncpa [#allocation3], 0  ;;  %s3338_s0 = inlined_call_operand.hbm [shape: f32[16,48], index: 0, kind: input, shape index: {}]   ;;  %s3339_s1 = inlined_call_operand.hbm [shape: bf16[48,1920], index: 1, kind: input, shape index: {}]   ;;  %s3340_s2 = inlined_call_operand.hbm [shape: f32[1,1920], index: 2, kind: input, shape index: {}]   ;;  %s3341_s3 = inlined_call_operand.hbm [shape: bf16[1920,128], index: 3, kind: input, shape index: {}]   ;;  %s3342_s4 = inlined_call_operand.vmem [shape: f32[1,128], index: 4, kind: input, shape index: {}]   ;;  %s3343_s5 = inlined_call_operand.hbm [shape: bf16[128,128], index: 5, kind: input, shape index: {}]   ;;  %s3344_s6 = inlined_call_operand.vmem [shape: f32[1,128], index: 6, kind: input, shape index: {}]   ;;  %s3345_s7 = inlined_call_operand.hbm [shape: f32[16,128], index: 7, kind: output, shape index: {}]  }
   0x1   :  { %13 = vsyncpa [#allocation6], 0 }
   0x2   :  { %14 = vsyncpa [#allocation9], 0 }
   0x3   :  { %15 = vsyncpa [#allocation4], 0  ;;  %s3058_s24 = smov [#allocation5]   ;;  %s2918_s28 = scalar_lea.hbm %s3339_s1, 5760 }
   0x4   :  { %s33_s25 = sshll.u32 %s3058_s24, 4  ;;  %p2919_p0 = scmp.ne.s32.totalorder %s3339_s1, %s2918_s28  ;;  %s34_s25 = int_to_ptr.vmem [resolvable:$true] %s33_s25 }
   0x5   :  { %p2922_p1 = scmp.lt.u32.totalorder %s2918_s28, %s3339_s1 }
   0x7   :  { %p2924_p2 = pnand %p2922_p1, %p2919_p0 }
   0x9   :  { %2927 = shalt.err (!%p2924_p2)
}
   0xa   :  { %s2928_s10 = scalar_lea.vmem %s34_s25, 5760  ;;  %p2933_p4 = scmp.lt.s32.totalorder %s34_s25, %s34_s25 }
   0xb   :  { %p2929_p3 = scmp.ne.s32.totalorder %s34_s25, %s2928_s10  ;;  %p2934_p5 = scmp.lt.s32.totalorder %s2928_s10, %s2928_s10 }
   0xd   :  { %p2935_p6 = por %p2934_p5, %p2933_p4 }
   0xf   :  { %p2936_p7 = pnand %p2935_p6, %p2929_p3 }
  0x11   :  { %2939 = shalt.err (!%p2936_p7)
}
  0x12   :  { %s3059_s11 = smov 960   ;;  %s3060_s12 = smov 60  }
  0x13   :  { %39 = dma.hbm_to_vmem [thread:$0]  %s3339_s1, 5760, %s34_s25, [#allocation6], %s3059_s11, %s3059_s11, %s3060_s12  }
  0x14   :  { %s3061_s15 = smov [#allocation8]   ;;  %s2940_s19 = scalar_lea.hbm %s3341_s3, 15360 }
  0x15   :  { %s55_s16 = sshll.u32 %s3061_s15, 4  ;;  %p2941_p8 = scmp.ne.s32.totalorder %s3341_s3, %s2940_s19  ;;  %s56_s16 = int_to_ptr.vmem [resolvable:$true] %s55_s16 }
  0x16   :  { %p2944_p9 = scmp.lt.u32.totalorder %s2940_s19, %s3341_s3 }
  0x18   :  { %p2946_p10 = pnand %p2944_p9, %p2941_p8 }
  0x1a   :  { %2949 = shalt.err (!%p2946_p10)
}
  0x1b   :  { %s2950_s24 = scalar_lea.vmem %s56_s16, 15360  ;;  %p2955_p12 = scmp.lt.s32.totalorder %s56_s16, %s56_s16 }
  0x1c   :  { %p2951_p11 = scmp.ne.s32.totalorder %s56_s16, %s2950_s24  ;;  %p2956_p13 = scmp.lt.s32.totalorder %s2950_s24, %s2950_s24 }
  0x1e   :  { %p2957_p0 = por %p2956_p13, %p2955_p12 }
  0x20   :  { %p2958_p1 = pnand %p2957_p0, %p2951_p11 }
  0x22   :  { %2961 = shalt.err (!%p2958_p1)
}
  0x23   :  { %s3062_s1 = smov 64   ;;  %s3063_s25 = smov 4  }
  0x24   :  { %61 = dma.hbm_to_vmem [thread:$0]  %s3341_s3, 15360, %s56_s16, [#allocation9], %s3062_s1, %s3062_s1, %s3063_s25  }
  0x25   :  { %s3064_s28 = smov [#allocation2]   ;;  %s2962_s9 = scalar_lea.hbm %s3338_s0, 256 }
  0x26   :  { %s21_s29 = sshll.u32 %s3064_s28, 4  ;;  %p2963_p2 = scmp.ne.s32.totalorder %s3338_s0, %s2962_s9  ;;  %s22_s29 = int_to_ptr.vmem [resolvable:$true] %s21_s29 }
  0x27   :  { %p2966_p3 = scmp.lt.u32.totalorder %s2962_s9, %s3338_s0 }
  0x29   :  { %p2968_p4 = pnand %p2966_p3, %p2963_p2 }
  0x2b   :  { %2971 = shalt.err (!%p2968_p4)
}
  0x2c   :  { %s2972_s14 = scalar_lea.vmem %s22_s29, 256  ;;  %p2977_p6 = scmp.lt.s32.totalorder %s22_s29, %s22_s29 }
  0x2d   :  { %p2973_p5 = scmp.ne.s32.totalorder %s22_s29, %s2972_s14  ;;  %p2978_p7 = scmp.lt.s32.totalorder %s2972_s14, %s2972_s14 }
  0x2f   :  { %p2979_p8 = por %p2978_p7, %p2977_p6 }
  0x31   :  { %p2980_p9 = pnand %p2979_p8, %p2973_p5 }
  0x33   :  { %2983 = shalt.err (!%p2980_p9)
}
  0x34   :  { %s3065_s3 = smov 128   ;;  %s3066_s15 = smov 8  }
  0x35   :  { %27 = dma.hbm_to_vmem [thread:$0]  %s3338_s0, 256, %s22_s29, [#allocation3], %s3065_s3, %s3065_s3, %s3066_s15  }
  0x36   :  { %s3067_s18 = smov [#allocation7]   ;;  %s3068_s20 = smov [#allocation10]  }
  0x37   :  { %s46_s19 = sshll.u32 %s3067_s18, 4  ;;  %s69_s21 = sshll.u32 %s3068_s20, 4  ;;  %s47_s19 = int_to_ptr.vmem [resolvable:$true] %s46_s19  ;;  %s70_s21 = int_to_ptr.vmem [resolvable:$true] %s69_s21 }
  0x38   :  { %s2984_s24 = scalar_lea.hbm %s3340_s2, 240 }
  0x39   :  { %p2985_p10 = scmp.ne.s32.totalorder %s3340_s2, %s2984_s24  ;;  %p2988_p11 = scmp.lt.u32.totalorder %s2984_s24, %s3340_s2 }
  0x3b   :  { %p2990_p12 = pnand %p2988_p11, %p2985_p10 }
  0x3d   :  { %2993 = shalt.err (!%p2990_p12)
}
  0x3e   :  { %s2994_s0 = scalar_lea.vmem %s47_s19, 240  ;;  %s2998_s29 = scalar_lea.vmem %s47_s19, 256 }
  0x3f   :  { %p2995_p13 = scmp.ne.s32.totalorder %s47_s19, %s2994_s0  ;;  %p2999_p0 = scmp.lt.s32.totalorder %s47_s19, %s47_s19 }
  0x40   :  { %p3000_p1 = scmp.lt.s32.totalorder %s2998_s29, %s2994_s0 }
  0x42   :  { %p3001_p2 = por %p3000_p1, %p2999_p0 }
  0x44   :  { %p3002_p3 = pnand %p3001_p2, %p2995_p13 }
  0x46   :  { %3005 = shalt.err (!%p3002_p3)
}
  0x47   :  { %49 = dma.hbm_to_vmem [thread:$0]  %s3340_s2, 240, %s47_s19, [#allocation6]  }
  0x48   :  { %s3006_s12 = scalar_lea.hbm %s3343_s5, 1024 }
  0x49   :  { %p3007_p4 = scmp.ne.s32.totalorder %s3343_s5, %s3006_s12  ;;  %p3010_p5 = scmp.lt.u32.totalorder %s3006_s12, %s3343_s5 }
  0x4b   :  { %p3012_p6 = pnand %p3010_p5, %p3007_p4 }
  0x4d   :  { %3015 = shalt.err (!%p3012_p6)
}
  0x4e   :  { %s3016_s18 = scalar_lea.vmem %s70_s21, 1024  ;;  %p3021_p8 = scmp.lt.s32.totalorder %s70_s21, %s70_s21 }
  0x4f   :  { %p3017_p7 = scmp.ne.s32.totalorder %s70_s21, %s3016_s18  ;;  %p3022_p9 = scmp.lt.s32.totalorder %s3016_s18, %s3016_s18 }
  0x51   :  { %p3023_p10 = por %p3022_p9, %p3021_p8 }
  0x53   :  { %p3024_p11 = pnand %p3023_p10, %p3017_p7 }
  0x55   :  { %3027 = shalt.err (!%p3024_p11)
}
  0x56   :  { %75 = dma.hbm_to_vmem [thread:$0]  %s3343_s5, 1024, %s70_s21, [#allocation9], %s3062_s1, %s3062_s1, %s3063_s25  }
  0x57   :  { %3050 = dma.done.wait [#allocation3], 256  }
  0x58   :  { %3051 = vsyncadd [#allocation3], 4294967040 }
  0x59   :  { %3052 = dma.done.wait [#allocation6], 6000  }
  0x5a   :  { %3053 = vsyncadd [#allocation6], 4294961296 }
  0x5b   :  { %3054 = dma.done.wait [#allocation9], 16384  }
  0x5c   :  { %3055 = vsyncadd [#allocation9], 4294950912  ;;  %v3069_v0 = vmov 0   ;;  %v2716_v1 = vld [vmem:[#allocation5 + $0x4] ss:$60 sps:$4 sm:$0xff]   ;;  %v94_v7 = vld [vmem:[#allocation2] sm:$0xff] }
  0x5d   :  { %488 = vmatprep.mubr.bf16.mxu1 %v3069_v0  ;;  %574 = vmatprep.mubr.bf16.mxu0 %v3069_v0  ;;  %v2718_v2 = vld [vmem:[#allocation5] ss:$60 sps:$4 sm:$0xff]   ;;  %v2721_v4 = vld [vmem:[#allocation5 + $0x78] ss:$60 sps:$4 sm:$0xff]   ;;  %v2724_v6 = vld [vmem:[#allocation5 + $0xf0] ss:$60 sps:$4 sm:$0xff]  }
  0x5e   :  { %456 = vmatprep.subr.bf16.mxu1 %v2716_v1  ;;  %v2719_v3 = vld [vmem:[#allocation5 + $0x7c] ss:$60 sps:$4 sm:$0xff]   ;;  %v2722_v5 = vld [vmem:[#allocation5 + $0xf4] ss:$60 sps:$4 sm:$0xff]   ;;  %v2727_v9 = vld [vmem:[#allocation5 + $0xc] ss:$60 sps:$4 sm:$0xff]  }
  0x5f   :  { %457 = vmatpush1.bf16.msra.mxu1 %v2718_v2  ;;  %v95_v8 = vld [vmem:[#allocation2 + $0x8] sm:$0xff]  ;;  %v2734_v10 = vld [vmem:[#allocation5 + $0x14] ss:$60 sps:$4 sm:$0xff]   ;;  %v2737_v13 = vld [vmem:[#allocation5 + $0x8c] ss:$60 sps:$4 sm:$0xff]   ;;  %vm452_vm0 = vcmask 392192  }
  0x60   :  { %458 = vmatprep.subr.bf16.mxu1 %v2719_v3  ;;  %v2736_v11 = vld [vmem:[#allocation5 + $0x10] ss:$60 sps:$4 sm:$0xff]   ;;  %v3184_v12 = vpack.c.bf16 %v95_v8, %v94_v7  ;;  %v2725_v14 = vld [vmem:[#allocation5 + $0x8] ss:$60 sps:$4 sm:$0xff]   ;;  %542 = vmatprep.subr.bf16.mxu0 %v2734_v10  ;;  %v2728_v18 = vld [vmem:[#allocation5 + $0x80] ss:$60 sps:$4 sm:$0xff]  }
  0x61   :  { %v2730_v15 = vld [vmem:[#allocation5 + $0x84] ss:$60 sps:$4 sm:$0xff]   ;;  %543 = vmatpush1.bf16.msra.mxu0 %v2736_v11  ;;  %v2733_v19 = vld [vmem:[#allocation5 + $0xfc] ss:$60 sps:$4 sm:$0xff]   ;;  %v2748_v27 = vld [vmem:[#allocation5 + $0x94] ss:$60 sps:$4 sm:$0xff]  }
  0x62   :  { %v2739_v16 = vld [vmem:[#allocation5 + $0x88] ss:$60 sps:$4 sm:$0xff]   ;;  %544 = vmatprep.subr.bf16.mxu0 %v2737_v13  ;;  %v2742_v20 = vld [vmem:[#allocation5 + $0x100] ss:$60 sps:$4 sm:$0xff]   ;;  %v2731_v22 = vld [vmem:[#allocation5 + $0xf8] ss:$60 sps:$4 sm:$0xff]  }
  0x63   :  { %459 = vmatpush1.bf16.msra.mxu1 %v2721_v4  ;;  %v2740_v17 = vld [vmem:[#allocation5 + $0x104] ss:$60 sps:$4 sm:$0xff]   ;;  %v2745_v23 = vld [vmem:[#allocation5 + $0x1c] ss:$60 sps:$4 sm:$0xff]   ;;  %v2760_v29 = vld [vmem:[#allocation5 + $0x114] ss:$60 sps:$4 sm:$0xff]  }
  0x64   :  { %460 = vmatprep.subr.bf16.mxu1 %v2722_v5  ;;  %v2754_v21 = vld [vmem:[#allocation5 + $0x24] ss:$60 sps:$4 sm:$0xff]   ;;  %v2757_v25 = vld [vmem:[#allocation5 + $0x9c] ss:$60 sps:$4 sm:$0xff]   ;;  %v2746_v30 = vld [vmem:[#allocation5 + $0x90] ss:$60 sps:$4 sm:$0xff]  }
  0x65   :  { %545 = vmatpush1.bf16.msra.mxu0 %v2739_v16  ;;  %v2752_v24 = vld [vmem:[#allocation5 + $0x20] ss:$60 sps:$4 sm:$0xff]   ;;  %v2743_v26 = vld [vmem:[#allocation5 + $0x18] ss:$60 sps:$4 sm:$0xff]   ;;  %v2751_v31 = vld [vmem:[#allocation5 + $0x10c] ss:$60 sps:$4 sm:$0xff]  }
  0x66   :  { %546 = vmatprep.subr.bf16.mxu0 %v2740_v17  ;;  %v2755_v28 = vld [vmem:[#allocation5 + $0x98] ss:$60 sps:$4 sm:$0xff]   ;;  %v2758_v32 = vld [vmem:[#allocation5 + $0x110] ss:$60 sps:$4 sm:$0xff]   ;;  %v2749_v34 = vld [vmem:[#allocation5 + $0x108] ss:$60 sps:$4 sm:$0xff]  }
  0x67   :  { %461 = vmatpush1.bf16.msra.mxu1 %v2724_v6  ;;  %v2772_v33 = vld [vmem:[#allocation5 + $0x34] ss:$60 sps:$4 sm:$0xff]   ;;  %v2763_v35 = vld [vmem:[#allocation5 + $0x2c] ss:$60 sps:$4 sm:$0xff]   ;;  %v2766_v39 = vld [vmem:[#allocation5 + $0xa4] ss:$60 sps:$4 sm:$0xff]  }
  0x68   :  { %499 = vmatprep.subr.bf16.mxu1 %v2727_v9  ;;  %v2770_v36 = vld [vmem:[#allocation5 + $0x30] ss:$60 sps:$4 sm:$0xff]   ;;  %v2761_v38 = vld [vmem:[#allocation5 + $0x28] ss:$60 sps:$4 sm:$0xff]   ;;  %v2764_v42 = vld [vmem:[#allocation5 + $0xa0] ss:$60 sps:$4 sm:$0xff]  }
  0x69   :  { %547 = vmatpush1.bf16.msra.mxu0 %v2742_v20  ;;  %v2775_v37 = vld [vmem:[#allocation5 + $0xac] ss:$60 sps:$4 sm:$0xff]   ;;  %v2778_v41 = vld [vmem:[#allocation5 + $0x124] ss:$60 sps:$4 sm:$0xff]   ;;  %v2769_v43 = vld [vmem:[#allocation5 + $0x11c] ss:$60 sps:$4 sm:$0xff]   ;;  %v149_v20 = vlaneseq }
  0x6a   :  { %2337 = vmatmul.mubr.msk.bf16.vlgmr.msra.gmra.mrb[0].mxu1 %vm452_vm0, %v3184_v12  ;;  %628 = vmatprep.subr.bf16.mxu0 %v2754_v21  ;;  %v2773_v40 = vld [vmem:[#allocation5 + $0xa8] ss:$60 sps:$4 sm:$0xff]   ;;  %v2776_v44 = vld [vmem:[#allocation5 + $0x120] ss:$60 sps:$4 sm:$0xff]   ;;  %v2767_v46 = vld [vmem:[#allocation5 + $0x118] ss:$60 sps:$4 sm:$0xff]  }
  0x6b   :  { %500 = vmatpush1.bf16.msra.mxu1 %v2725_v14  ;;  %531 = vmatprep.mubr.bf16.mxu1 %v3069_v0  ;;  %v2782_v45 = vld [vmem:[#allocation8 + $0x40] sm:$0xff]   ;;  %v2784_v48 = vld [vmem:[#allocation8 + $0x48] sm:$0xff]   ;;  %v3070_v50 = vmov 0.0   ;;  %v2780_v52 = vld [vmem:[#allocation5 + $0xb0] ss:$60 sps:$4 sm:$0xff]   ;;  %vm3071_vm1 = vmmov 0  }
  0x6c   :  { %501 = vmatprep.subr.bf16.mxu1 %v2730_v15  ;;  %2339 = vmatmul.mubr.msk.bf16.vlgmr.msra.gmra.mrb[0].mxu0 %vm452_vm0, %v3184_v12  ;;  %v2783_v47 = vld [vmem:[#allocation8] sm:$0xff]   ;;  %v2785_v51 = vld [vmem:[#allocation8 + $0x8] sm:$0xff]   ;;  %v2786_v53 = vld [vmem:[#allocation8 + $0x50] sm:$0xff]   ;;  %v3212_v21 = vshrl.u32 %v149_v20, 7 }
  0x6d   :  { %629 = vmatpush1.bf16.msra.mxu0 %v2752_v24  ;;  %660 = vmatprep.mubr.bf16.mxu0 %v3069_v0  ;;  %v2779_v49 = vld [vmem:[#allocation5 + $0x38] ss:$60 sps:$4 sm:$0xff]   ;;  %v2787_v54 = vld [vmem:[#allocation8 + $0x10] sm:$0xff]   ;;  %v2793_v61 = vld [vmem:[#allocation8 + $0xc8] sm:$0xff]  }
  0x6e   :  { %630 = vmatprep.subr.bf16.mxu0 %v2757_v25  ;;  %v2788_v55 = vld [vmem:[#allocation8 + $0x58] sm:$0xff]   ;;  %v2781_v56 = vld [vmem:[#allocation5 + $0x128] ss:$60 sps:$4 sm:$0xff]   ;;  %v2789_v57 = vld [vmem:[#allocation8 + $0xc0] sm:$0xff]   ;;  %v151_v25 = vsub.s32 0, %v3212_v21 }
  0x6f   :  { %502 = vmatpush1.bf16.msra.mxu1 %v2728_v18  ;;  %v2790_v58 = vld [vmem:[#allocation8 + $0x18] sm:$0xff]   ;;  %v2792_v59 = vld [vmem:[#allocation8 + $0x60] sm:$0xff]   ;;  %v2796_v63 = vld [vmem:[#allocation8 + $0x68] sm:$0xff]  }
  0x70   :  { %503 = vmatprep.subr.bf16.mxu1 %v2733_v19  ;;  %v2791_v60 = vld [vmem:[#allocation8 + $0x80] sm:$0xff]   ;;  %v2797_v1 = vld [vmem:[#allocation8 + $0xd0] sm:$0xff]   ;;  %v2798_v2 = vld [vmem:[#allocation8 + $0x28] sm:$0xff]  }
  0x71   :  { %631 = vmatpush1.bf16.msra.mxu0 %v2755_v28  ;;  %v2794_v62 = vld [vmem:[#allocation8 + $0x20] sm:$0xff]   ;;  %v2799_v3 = vld [vmem:[#allocation8 + $0x90] sm:$0xff]   ;;  %v2801_v5 = vld [vmem:[#allocation8 + $0xd8] sm:$0xff]  }
  0x72   :  { %632 = vmatprep.subr.bf16.mxu0 %v2760_v29  ;;  %v2800_v4 = vld [vmem:[#allocation8 + $0x70] sm:$0xff]   ;;  %v2803_v7 = vld [vmem:[#allocation8 + $0x98] sm:$0xff]   ;;  %v2805_v9 = vld [vmem:[#allocation8 + $0xe0] sm:$0xff]  }
  0x73   :  { %504 = vmatpush1.bf16.msra.mxu1 %v2731_v22  ;;  %v2802_v6 = vld [vmem:[#allocation8 + $0x30] sm:$0xff]   ;;  %v2804_v8 = vld [vmem:[#allocation8 + $0x78] sm:$0xff]   ;;  %v2807_v11 = vld [vmem:[#allocation8 + $0xa0] sm:$0xff]   ;;  %v175_v22 = vsub.s32 6, %v3212_v21 }
  0x74   :  { %585 = vmatprep.subr.bf16.mxu1 %v2745_v23  ;;  %v2806_v10 = vld [vmem:[#allocation8 + $0x38] sm:$0xff]   ;;  %v2809_v13 = vld [vmem:[#allocation8 + $0x140] sm:$0xff]   ;;  %v2810_v14 = vld [vmem:[#allocation8 + $0xa8] sm:$0xff]  }
  0x75   :  { %633 = vmatpush1.bf16.msra.mxu0 %v2758_v32  ;;  %v2812_v15 = vld [vmem:[#allocation8 + $0xf0] sm:$0xff]   ;;  %v2816_v17 = vld [vmem:[#allocation8 + $0xf8] sm:$0xff]   ;;  %v2821_v19 = vld [vmem:[#allocation8 + $0x1c0] sm:$0xff]  }
  0x76   :  { %2338 = vmatmul.mubr.msk.bf16.vlgmr.msra.gmra.mrb[4].mxu1 %vm452_vm0, %v3184_v12  ;;  %714 = vmatprep.subr.bf16.mxu0 %v2772_v33  ;;  %v2814_v16 = vld [vmem:[#allocation8 + $0xb0] sm:$0xff]   ;;  %v2818_v18 = vld [vmem:[#allocation8 + $0xb8] sm:$0xff]  }
  0x77   :  { %586 = vmatpush1.bf16.msra.mxu1 %v2743_v26  ;;  %617 = vmatprep.mubr.bf16.mxu1 %v3069_v0  ;;  %v3215_v23 = vld [vmem:[#allocation7 + $0x8] sm:$0xff]  ;;  %v3223_v26 = vld [vmem:[#allocation7] sm:$0xff] }
  0x78   :  { %587 = vmatprep.subr.bf16.mxu1 %v2748_v27  ;;  %2341 = vmatmul.mubr.msk.bf16.vlgmr.msra.gmra.mrb[4].mxu0 %vm452_vm0, %v3184_v12  ;;  %v3220_v24 = vrot.slane %v3215_v23, %v175_v22  ;;  %v155_v27 = vsub.s32 1, %v3212_v21  ;;  %v152_v28 = vrot.slane %v3223_v26, %v151_v25 }
  0x79   :  { %715 = vmatpush1.bf16.msra.mxu0 %v2770_v36  ;;  %746 = vmatprep.mubr.bf16.mxu0 %v3069_v0 }
  0x7a   :  { %716 = vmatprep.subr.bf16.mxu0 %v2775_v37  ;;  %v156_v29 = vrot.slane %v3223_v26, %v155_v27 }
  0x7b   :  { %588 = vmatpush1.bf16.msra.mxu1 %v2746_v30 }
  0x7c   :  { %589 = vmatprep.subr.bf16.mxu1 %v2751_v31 }
  0x7d   :  { %717 = vmatpush1.bf16.msra.mxu0 %v2773_v40 }
  0x7e   :  { %718 = vmatprep.subr.bf16.mxu0 %v2778_v41 }
  0x7f   :  { %590 = vmatpush1.bf16.msra.mxu1 %v2749_v34 }
  0x80   :  { %671 = vmatprep.subr.bf16.mxu1 %v2763_v35  ;;  %v167_v35 = vsub.s32 4, %v3212_v21 }
  0x81   :  { %719 = vmatpush1.bf16.msra.mxu0 %v2776_v44 }
  0x82   :  { %2340 = vmatmul.mubr.msk.bf16.vlgmr.msra.gmra.mrb[8].mxu1 %vm452_vm0, %v3184_v12  ;;  %2479 = vmatprep.subr.bf16.mxu0 %v2782_v45  ;;  %v163_v45 = vsub.s32 3, %v3212_v21 }
  0x83   :  { %672 = vmatpush1.bf16.msra.mxu1 %v2761_v38  ;;  %703 = vmatprep.mubr.bf16.mxu1 %v3069_v0  ;;  %v2795_v0 = vld [vmem:[#allocation8 + $0x88] sm:$0xff]  }
  0x84   :  { %673 = vmatprep.subr.bf16.mxu1 %v2766_v39  ;;  %2343 = vmatmul.mubr.msk.bf16.vlgmr.msra.gmra.mrb[8].mxu0 %vm452_vm0, %v3184_v12  ;;  %v171_v39 = vsub.s32 5, %v3212_v21 }
  0x85   :  { %2480 = vmatpush3.bf16.msra.mxu0 %v2783_v47 }
  0x86   :  { %2481 = vmatprep.subr.bf16.mxu0 %v2784_v48  ;;  %v172_v48 = vrot.slane %v3223_v26, %v171_v39 }
  0x87   :  { %674 = vmatpush1.bf16.msra.mxu1 %v2764_v42  ;;  %v159_v42 = vsub.s32 2, %v3212_v21 }
  0x88   :  { %675 = vmatprep.subr.bf16.mxu1 %v2769_v43 }
  0x89   :  { %2482 = vmatpush3.bf16.msra.mxu0 %v2785_v51  ;;  %v2811_v51 = vld [vmem:[#allocation8 + $0x100] sm:$0xff]  }
  0x8a   :  { %2483 = vmatprep.subr.bf16.mxu0 %v2786_v53  ;;  %v2813_v53 = vld [vmem:[#allocation8 + $0x148] sm:$0xff]  }
  0x8b   :  { %676 = vmatpush1.bf16.msra.mxu1 %v2767_v46  ;;  %v168_v46 = vrot.slane %v3223_v26, %v167_v35 }
  0x8c   :  { %2651 = vmatprep.subr.bf16.mxu1 %v3070_v50 }
  0x8d   :  { %2484 = vmatpush3.bf16.msra.mxu0 %v2787_v54 }
  0x8e   :  { %2342 = vmatmul.mubr.msk.bf16.vlgmr.msra.gmra.mrb[12].mxu1 %vm452_vm0, %v3184_v12  ;;  %2485 = vmatprep.subr.bf16.mxu0 %v2788_v55  ;;  %v164_v55 = vrot.slane %v3223_v26, %v163_v45 }
  0x8f   :  { %2652 = vmatpush3.bf16.msra.mxu1 %v2779_v49  ;;  %2657 = vmatprep.mubr.msk.bf16.mxu1 %vm3071_vm1, %v3070_v50 }
  0x90   :  { %2653 = vmatprep.subr.bf16.mxu1 %v3070_v50 }
  0x91   :  { %2486 = vmatpush3.bf16.msra.mxu0 %v2790_v58 }
  0x92   :  { %2487 = vmatprep.subr.bf16.mxu0 %v2792_v59 }
  0x93   :  { %2654 = vmatpush3.bf16.msra.mxu1 %v2780_v52  ;;  %v160_v52 = vrot.slane %v3223_v26, %v159_v42 }
  0x94   :  { %2655 = vmatprep.subr.bf16.mxu1 %v3070_v50 }
  0x95   :  { %2488 = vmatpush3.bf16.msra.mxu0 %v2794_v62 }
  0x96   :  { %2489 = vmatprep.subr.bf16.mxu0 %v2796_v63 }
  0x97   :  { %2656 = vmatpush3.bf16.msra.mxu1 %v2781_v56 }
  0x98   :  { %2501 = vmatprep.subr.bf16.mxu1 %v2789_v57 }
  0x99   :  { %2490 = vmatpush3.bf16.msra.mxu0 %v2798_v2 }
  0x9a   :  { %2658 = vmatmul.mubr.msk.bf16.vlgmr.msra.gmra.mrb[16].mxu1 %vm452_vm0, %v3184_v12  ;;  %2491 = vmatprep.subr.bf16.mxu0 %v2800_v4  ;;  %v2808_v12 = vld [vmem:[#allocation8 + $0xe8] sm:$0xff]  }
  0x9b   :  { %2502 = vmatpush3.bf16.msra.mxu1 %v2791_v60 }
  0x9c   :  { %2503 = vmatprep.subr.bf16.mxu1 %v2793_v61  ;;  %v2815_v61 = vld [vmem:[#allocation8 + $0x108] sm:$0xff]  }
  0x9d   :  { %2492 = vmatpush3.bf16.msra.mxu0 %v2802_v6 }
  0x9e   :  { %2493 = vmatprep.subr.bf16.mxu0 %v2804_v8 }
  0x9f   :  { %2504 = vmatpush3.bf16.msra.mxu1 %v2795_v0 }
  0xa0   :  { %2505 = vmatprep.subr.bf16.mxu1 %v2797_v1 }
  0xa1   :  { %2494 = vmatpush3.bf16.msra.mxu0 %v2806_v10 }
  0xa2   :  { %2523 = vmatprep.subr.bf16.mxu0 %v2809_v13  ;;  %v2819_v13 = vld [vmem:[#allocation8 + $0x110] sm:$0xff]  }
  0xa3   :  { %2506 = vmatpush3.bf16.msra.mxu1 %v2799_v3  ;;  %v2817_v3 = vld [vmem:[#allocation8 + $0x150] sm:$0xff]  }
  0xa4   :  { %2507 = vmatprep.subr.bf16.mxu1 %v2801_v5 }
  0xa7   :  { %2508 = vmatpush3.bf16.msra.mxu1 %v2803_v7 }
  0xa8   :  { %2509 = vmatprep.subr.bf16.mxu1 %v2805_v9 }
  0xab   :  { %2510 = vmatpush3.bf16.msra.mxu1 %v2807_v11 }
  0xac   :  { %2511 = vmatprep.subr.bf16.mxu1 %v2808_v12 }
  0xaf   :  { %2512 = vmatpush3.bf16.msra.mxu1 %v2810_v14 }
  0xb0   :  { %2513 = vmatprep.subr.bf16.mxu1 %v2812_v15 }
  0xb3   :  { %2514 = vmatpush3.bf16.msra.mxu1 %v2814_v16 }
  0xb4   :  { %2515 = vmatprep.subr.bf16.mxu1 %v2816_v17  ;;  %v2820_v17 = vld [vmem:[#allocation8 + $0x158] sm:$0xff]  }
  0xb7   :  { %2516 = vmatpush3.bf16.msra.mxu1 %v2818_v18 }
  0xb8   :  { %2545 = vmatprep.subr.bf16.mxu1 %v2821_v19 }
 0x13d   :  { %v490_v30 = vpop.f32.mrb[0].mxu1 }
 0x13e   :  { %v491_v31 = vadd.f32 %v490_v30, %v152_v28  ;;  %v492_v32 = vpop.f32.mrb[1].mxu1 }
 0x13f   :  { %v493_v33 = vadd.f32 %v492_v32, %v156_v29  ;;  %v494_v34 = vpop.f32.mrb[2].mxu1  ;;  %v576_v54 = vpop.f32.mrb[0].mxu0 }
 0x140   :  { %v798_v36 = vmax.f32 %v491_v31, 0.0  ;;  %v495_v37 = vadd.f32 %v494_v34, %v152_v28  ;;  %v496_v38 = vpop.f32.mrb[3].mxu1  ;;  %v577_v56 = vadd.f32 %v576_v54, %v168_v46  ;;  %v578_v57 = vpop.f32.mrb[1].mxu0  ;;  %v179_v28 = vsub.s32 7, %v3212_v21  ;;  %v2823_v34 = vld [vmem:[#allocation8 + $0x180] sm:$0xff]  }
 0x141   :  { %v497_v40 = vadd.f32 %v496_v38, %v156_v29  ;;  %v799_v43 = vmax.f32 %v493_v33, 0.0  ;;  %v579_v58 = vadd.f32 %v578_v57, %v172_v48  ;;  %v580_v59 = vpop.f32.mrb[2].mxu0  ;;  %v184_v29 = vrot.slane %v3215_v23, %v151_v25  ;;  %v2822_v33 = vld [vmem:[#allocation8 + $0x118] sm:$0xff]  }
 0x142   :  { %v813_v41 = vmax.f32 %v495_v37, 0.0  ;;  %v802_v62 = vmax.f32 %v577_v56, 0.0  ;;  %v581_v63 = vadd.f32 %v580_v59, %v168_v46  ;;  %v582_v0 = vpop.f32.mrb[3].mxu0  ;;  %v188_v31 = vrot.slane %v3215_v23, %v155_v27  ;;  %v2825_v37 = vld [vmem:[#allocation8 + $0x1c8] sm:$0xff]   ;;  %v2826_v46 = vld [vmem:[#allocation8 + $0x120] sm:$0xff]  }
 0x143   :  { %v814_v44 = vmax.f32 %v497_v40, 0.0  ;;  %v803_v4 = vmax.f32 %v579_v58, 0.0  ;;  %v583_v5 = vadd.f32 %v582_v0, %v172_v48  ;;  %v176_v38 = vrot.slane %v3223_v26, %v175_v22  ;;  %v2828_v22 = vld [vmem:[#allocation8 + $0x168] sm:$0xff]  }
 0x144   :  { %v828_v47 = vpack.c.bf16 %v813_v41, %v798_v36  ;;  %v817_v8 = vmax.f32 %v581_v63, 0.0  ;;  %v2824_v36 = vld [vmem:[#allocation8 + $0x160] sm:$0xff]   ;;  %v180_v25 = vrot.slane %v3223_v26, %v179_v28  ;;  %v2830_v0 = vld [vmem:[#allocation8 + $0x128] sm:$0xff]  }
 0x145   :  { %v829_v49 = vpack.c.bf16 %v814_v44, %v799_v43  ;;  %v818_v11 = vmax.f32 %v583_v5, 0.0  ;;  %v2832_v5 = vld [vmem:[#allocation8 + $0x170] sm:$0xff]  }
 0x146   :  { %v3248_v14 = vpack.c.bf16 %v817_v8, %v802_v62 }
 0x147   :  { %1842 = vmatprep.mubr.bf16.mxu0 %v829_v49  ;;  %v833_v18 = vpack.c.bf16 %v818_v11, %v803_v4 }
 0x148   :  { %1843 = vmatmul.mubr.bf16.vlgmr.msra.gmra.mrb[12].mxu0 %v828_v47  ;;  %v2827_v47 = vld [vmem:[#allocation8 + $0x188] sm:$0xff]  }
 0x149   :  { %2524 = vmatpush3.bf16.msra.mxu0 %v2811_v51  ;;  %v533_v60 = vpop.f32.mrb[4].mxu1  ;;  %1924 = vmatprep.mubr.bf16.mxu0 %v833_v18  ;;  %v2837_v18 = vld [vmem:[#allocation8 + $0x1e0] sm:$0xff]  }
 0x14a   :  { %v534_v1 = vadd.f32 %v533_v60, %v160_v52  ;;  %v535_v2 = vpop.f32.mrb[5].mxu1  ;;  %2525 = vmatprep.subr.bf16.mxu0 %v2813_v53  ;;  %v2829_v53 = vld [vmem:[#allocation8 + $0x1d0] sm:$0xff]  }
 0x14b   :  { %v536_v6 = vadd.f32 %v535_v2, %v164_v55  ;;  %v537_v7 = vpop.f32.mrb[6].mxu1  ;;  %v662_v40 = vpop.f32.mrb[4].mxu0 }
 0x14c   :  { %v538_v9 = vadd.f32 %v537_v7, %v160_v52  ;;  %v539_v10 = vpop.f32.mrb[7].mxu1  ;;  %v800_v15 = vmax.f32 %v534_v1, 0.0  ;;  %v663_v41 = vadd.f32 %v662_v40, %v184_v29  ;;  %v664_v43 = vpop.f32.mrb[5].mxu0  ;;  %v2831_v1 = vld [vmem:[#allocation8 + $0x190] sm:$0xff]  }
 0x14d   :  { %v540_v12 = vadd.f32 %v539_v10, %v164_v55  ;;  %2526 = vmatpush3.bf16.msra.mxu0 %v2815_v61  ;;  %v801_v19 = vmax.f32 %v536_v6, 0.0  ;;  %v665_v44 = vadd.f32 %v664_v43, %v188_v31  ;;  %v666_v27 = vpop.f32.mrb[6].mxu0  ;;  %v2833_v6 = vld [vmem:[#allocation8 + $0x1d8] sm:$0xff]   ;;  %v200_v10 = vrot.slane %v3215_v23, %v167_v35 }
 0x14e   :  { %v815_v16 = vmax.f32 %v538_v9, 0.0  ;;  %2527 = vmatprep.subr.bf16.mxu0 %v2817_v3  ;;  %v806_v49 = vmax.f32 %v663_v41, 0.0  ;;  %v667_v51 = vadd.f32 %v666_v27, %v184_v29  ;;  %v668_v52 = vpop.f32.mrb[7].mxu0 }
 0x14f   :  { %v816_v20 = vmax.f32 %v540_v12, 0.0  ;;  %v807_v26 = vmax.f32 %v665_v44, 0.0  ;;  %v669_v56 = vadd.f32 %v668_v52, %v188_v31  ;;  %v204_v12 = vrot.slane %v3215_v23, %v171_v39  ;;  %v2838_v31 = vld [vmem:[#allocation8 + $0x138] sm:$0xff]  }
 0x150   :  { %v830_v30 = vpack.c.bf16 %v815_v16, %v800_v15  ;;  %v821_v59 = vmax.f32 %v667_v51, 0.0  ;;  %v2835_v15 = vld [vmem:[#allocation8 + $0x198] sm:$0xff]  }
 0x151   :  { %v831_v32 = vpack.c.bf16 %v816_v20, %v801_v19  ;;  %2528 = vmatpush3.bf16.msra.mxu0 %v2819_v13  ;;  %v822_v63 = vmax.f32 %v669_v56, 0.0  ;;  %v2834_v13 = vld [vmem:[#allocation8 + $0x130] sm:$0xff]   ;;  %v192_v19 = vrot.slane %v3215_v23, %v159_v42  ;;  %v196_v20 = vrot.slane %v3215_v23, %v163_v45  ;;  %v2840_v42 = vld [vmem:[#allocation8 + $0x1e8] sm:$0xff]  }
 0x152   :  { %2529 = vmatprep.subr.bf16.mxu0 %v2820_v17  ;;  %v3261_v4 = vpack.c.bf16 %v821_v59, %v806_v49  ;;  %v2836_v17 = vld [vmem:[#allocation8 + $0x178] sm:$0xff]   ;;  %v2843_v49 = vld [vmem:[#allocation8 + $0x200] sm:$0xff]   ;;  %v2847_v59 = vld [vmem:[#allocation8 + $0x208] sm:$0xff]  }
 0x153   :  { %1883 = vmatprep.mubr.bf16.mxu1 %v831_v32  ;;  %v3263_v8 = vpack.c.bf16 %v822_v63, %v807_v26  ;;  %v2839_v32 = vld [vmem:[#allocation8 + $0x1a0] sm:$0xff]   ;;  %v2850_v63 = vld [vmem:[#allocation8 + $0x1b8] sm:$0xff]  }
 0x154   :  { %1884 = vmatmul.mubr.bf16.vlgmr.msra.gmra.mrb[20].mxu1 %v830_v30 }
 0x155   :  { %2530 = vmatpush3.bf16.msra.mxu0 %v2822_v33  ;;  %2546 = vmatpush3.bf16.msra.mxu1 %v2823_v34  ;;  %v619_v48 = vpop.f32.mrb[8].mxu1 }
 0x156   :  { %2531 = vmatprep.subr.bf16.mxu0 %v2824_v36  ;;  %2547 = vmatprep.subr.bf16.mxu1 %v2825_v37  ;;  %v620_v54 = vadd.f32 %v619_v48, %v176_v38  ;;  %v621_v55 = vpop.f32.mrb[9].mxu1  ;;  %v2842_v48 = vld [vmem:[#allocation8 + $0x1a8] sm:$0xff]  }
 0x157   :  { %v622_v57 = vadd.f32 %v621_v55, %v180_v25  ;;  %v623_v58 = vpop.f32.mrb[10].mxu1  ;;  %v748_v35 = vpop.f32.mrb[8].mxu0 }
 0x158   :  { %v804_v60 = vmax.f32 %v620_v54, 0.0  ;;  %v624_v61 = vadd.f32 %v623_v58, %v176_v38  ;;  %v625_v62 = vpop.f32.mrb[11].mxu1  ;;  %v749_v39 = vadd.f32 %v748_v35, %v200_v10  ;;  %v750_v28 = vpop.f32.mrb[9].mxu0  ;;  %v2841_v38 = vld [vmem:[#allocation8 + $0x240] sm:$0xff]   ;;  %v2845_v54 = vld [vmem:[#allocation8 + $0x248] sm:$0xff]   ;;  %v2846_v58 = vld [vmem:[#allocation8 + $0x1b0] sm:$0xff]  }
 0x159   :  { %2532 = vmatpush3.bf16.msra.mxu0 %v2826_v46  ;;  %2548 = vmatpush3.bf16.msra.mxu1 %v2827_v47  ;;  %v805_v2 = vmax.f32 %v622_v57, 0.0  ;;  %v626_v3 = vadd.f32 %v625_v62, %v180_v25  ;;  %v751_v29 = vadd.f32 %v750_v28, %v204_v12  ;;  %v752_v30 = vpop.f32.mrb[10].mxu0  ;;  %v2849_v62 = vld [vmem:[#allocation8 + $0x250] sm:$0xff]  }
 0x15a   :  { %2533 = vmatprep.subr.bf16.mxu0 %v2828_v22  ;;  %2549 = vmatprep.subr.bf16.mxu1 %v2829_v53  ;;  %v819_v7 = vmax.f32 %v624_v61, 0.0  ;;  %v810_v34 = vmax.f32 %v749_v39, 0.0  ;;  %v753_v36 = vadd.f32 %v752_v30, %v200_v10  ;;  %v754_v37 = vpop.f32.mrb[11].mxu0  ;;  %v2844_v53 = vld [vmem:[#allocation8 + $0x1f0] sm:$0xff]   ;;  %v2848_v61 = vld [vmem:[#allocation8 + $0x1f8] sm:$0xff]  }
 0x15b   :  { %v820_v9 = vmax.f32 %v626_v3, 0.0  ;;  %v811_v25 = vmax.f32 %v751_v29, 0.0  ;;  %v755_v23 = vadd.f32 %v754_v37, %v204_v12  ;;  %v2855_v12 = vld [vmem:[#allocation8 + $0x280] sm:$0xff]   ;;  %v2861_v35 = vld [vmem:[#allocation8 + $0x2d0] sm:$0xff]   ;;  %v2865_v29 = vld [vmem:[#allocation8 + $0x2d8] sm:$0xff]  }
 0x15c   :  { %v3268_v11 = vpack.c.bf16 %v819_v7, %v804_v60  ;;  %v825_v43 = vmax.f32 %v753_v36, 0.0  ;;  %v2863_v39 = vld [vmem:[#allocation8 + $0x290] sm:$0xff]   ;;  %v2867_v30 = vld [vmem:[#allocation8 + $0x298] sm:$0xff]   ;;  %v2872_v36 = vld [vmem:[#allocation8 + $0x2e8] sm:$0xff]  }
 0x15d   :  { %2534 = vmatpush3.bf16.msra.mxu0 %v2830_v0  ;;  %2550 = vmatpush3.bf16.msra.mxu1 %v2831_v1  ;;  %v835_v16 = vpack.c.bf16 %v820_v9, %v805_v2  ;;  %v826_v47 = vmax.f32 %v755_v23, 0.0  ;;  %v2851_v0 = vld [vmem:[#allocation8 + $0x210] sm:$0xff]   ;;  %v2853_v2 = vld [vmem:[#allocation8 + $0x2c0] sm:$0xff]   ;;  %v2879_v23 = vld [vmem:[#allocation8 + $0x308] sm:$0xff]  }
 0x15e   :  { %2535 = vmatprep.subr.bf16.mxu0 %v2832_v5  ;;  %2551 = vmatprep.subr.bf16.mxu1 %v2833_v6  ;;  %v3279_v22 = vpack.c.bf16 %v825_v43, %v810_v34  ;;  %v2864_v28 = vld [vmem:[#allocation8 + $0x270] sm:$0xff]   ;;  %v2871_v34 = vld [vmem:[#allocation8 + $0x2a0] sm:$0xff]   ;;  %v2882_v43 = vld [vmem:[#allocation8 + $0x2b8] sm:$0xff]  }
 0x15f   :  { %1965 = vmatprep.mubr.bf16.mxu1 %v835_v16  ;;  %v3281_v26 = vpack.c.bf16 %v826_v47, %v811_v25  ;;  %v2873_v37 = vld [vmem:[#allocation8 + $0x340] sm:$0xff]   ;;  %v2878_v25 = vld [vmem:[#allocation8 + $0x2b0] sm:$0xff]  }
 0x160   :  { %v2887_v47 = vld [vmem:[#allocation8 + $0x360] sm:$0xff]  }
 0x161   :  { %2536 = vmatpush3.bf16.msra.mxu0 %v2834_v13  ;;  %2552 = vmatpush3.bf16.msra.mxu1 %v2835_v15  ;;  %v705_v33 = vpop.f32.mrb[12].mxu1  ;;  %v2856_v13 = vld [vmem:[#allocation8 + $0x260] sm:$0xff]   ;;  %v2857_v15 = vld [vmem:[#allocation8 + $0x2c8] sm:$0xff]  }
 0x162   :  { %2537 = vmatprep.subr.bf16.mxu0 %v2836_v17  ;;  %2553 = vmatprep.subr.bf16.mxu1 %v2837_v18  ;;  %v706_v40 = vadd.f32 %v705_v33, %v192_v19  ;;  %v707_v21 = vpop.f32.mrb[13].mxu1  ;;  %v2858_v18 = vld [vmem:[#allocation8 + $0x220] sm:$0xff]   ;;  %v2870_v33 = vld [vmem:[#allocation8 + $0x238] sm:$0xff]  }
 0x163   :  { %v708_v45 = vadd.f32 %v707_v21, %v196_v20  ;;  %v709_v41 = vpop.f32.mrb[14].mxu1  ;;  %v2877_v21 = vld [vmem:[#allocation8 + $0x348] sm:$0xff]  }
 0x164   :  { %v808_v44 = vmax.f32 %v706_v40, 0.0  ;;  %v710_v27 = vadd.f32 %v709_v41, %v192_v19  ;;  %v711_v46 = vpop.f32.mrb[15].mxu1  ;;  %v2859_v19 = vld [vmem:[#allocation8 + $0x288] sm:$0xff]   ;;  %v2876_v40 = vld [vmem:[#allocation8 + $0x2f0] sm:$0xff]  }
 0x165   :  { %2538 = vmatpush3.bf16.msra.mxu0 %v2838_v31  ;;  %2554 = vmatpush3.bf16.msra.mxu1 %v2839_v32  ;;  %v809_v51 = vmax.f32 %v708_v45, 0.0  ;;  %v712_v52 = vadd.f32 %v711_v46, %v196_v20  ;;  %v2862_v20 = vld [vmem:[#allocation8 + $0x228] sm:$0xff]   ;;  %v2868_v31 = vld [vmem:[#allocation8 + $0x278] sm:$0xff]   ;;  %v2869_v32 = vld [vmem:[#allocation8 + $0x2e0] sm:$0xff]  }
 0x166   :  { %2555 = vmatprep.subr.bf16.mxu1 %v2840_v42  ;;  %2567 = vmatprep.subr.bf16.mxu0 %v2841_v38  ;;  %v823_v55 = vmax.f32 %v710_v27, 0.0  ;;  %v2874_v42 = vld [vmem:[#allocation8 + $0x2a8] sm:$0xff]   ;;  %v2875_v38 = vld [vmem:[#allocation8 + $0x300] sm:$0xff]   ;;  %v2880_v45 = vld [vmem:[#allocation8 + $0x2f8] sm:$0xff]  }
 0x167   :  { %v824_v56 = vmax.f32 %v712_v52, 0.0  ;;  %v2881_v41 = vld [vmem:[#allocation8 + $0x350] sm:$0xff]   ;;  %v2884_v27 = vld [vmem:[#allocation8 + $0x358] sm:$0xff]   ;;  %v2886_v46 = vld [vmem:[#allocation8 + $0x380] sm:$0xff]  }
 0x168   :  { %1925 = vmatmul.mubr.bf16.vlgmr.msra.gmra.mrb[16].mxu0 %v3248_v14  ;;  %v3284_v57 = vpack.c.bf16 %v823_v55, %v808_v44  ;;  %v2852_v14 = vld [vmem:[#allocation8 + $0x258] sm:$0xff]   ;;  %v2883_v44 = vld [vmem:[#allocation8 + $0x310] sm:$0xff]   ;;  %v2891_v52 = vld [vmem:[#allocation8 + $0x328] sm:$0xff]  }
 0x169   :  { %2556 = vmatpush3.bf16.msra.mxu1 %v2842_v48  ;;  %2568 = vmatpush3.bf16.msra.mxu0 %v2843_v49  ;;  %v839_v60 = vpack.c.bf16 %v824_v56, %v809_v51  ;;  %v2888_v48 = vld [vmem:[#allocation8 + $0x320] sm:$0xff]   ;;  %v2889_v49 = vld [vmem:[#allocation8 + $0x388] sm:$0xff]   ;;  %v2894_v55 = vld [vmem:[#allocation8 + $0x330] sm:$0xff]  }
 0x16a   :  { %2557 = vmatprep.subr.bf16.mxu1 %v2844_v53  ;;  %2569 = vmatprep.subr.bf16.mxu0 %v2845_v54  ;;  %v2890_v51 = vld [vmem:[#allocation8 + $0x368] sm:$0xff]   ;;  %v2892_v53 = vld [vmem:[#allocation8 + $0x390] sm:$0xff]   ;;  %v2896_v56 = vld [vmem:[#allocation8 + $0x378] sm:$0xff]  }
 0x16b   :  { %2006 = vmatprep.mubr.bf16.mxu0 %v3263_v8  ;;  %v2854_v8 = vld [vmem:[#allocation8 + $0x218] sm:$0xff]   ;;  %v2893_v54 = vld [vmem:[#allocation8 + $0x370] sm:$0xff]  }
 0x16d   :  { %2558 = vmatpush3.bf16.msra.mxu1 %v2846_v58  ;;  %2570 = vmatpush3.bf16.msra.mxu0 %v2847_v59  ;;  %v791_v1 = vpop.f32.mrb[16].mxu1  ;;  %v2898_v58 = vld [vmem:[#allocation8 + $0x3a0] sm:$0xff]   ;;  %v2899_v59 = vld [vmem:[#allocation8 + $0x3a8] sm:$0xff]  }
 0x16e   :  { %2559 = vmatprep.subr.bf16.mxu1 %v2848_v61  ;;  %2571 = vmatprep.subr.bf16.mxu0 %v2849_v62  ;;  %v792_v3 = vadd.f32 %v791_v1, %v3220_v24  ;;  %v2659_v5 = vpop.f32.mrb[17].mxu1  ;;  %v2901_v61 = vld [vmem:[#allocation8 + $0x3b8] sm:$0xff]   ;;  %v2902_v62 = vld [vmem:[#allocation10] sm:$0xff]  }
 0x16f   :  { %v794_v6 = vpop.f32.mrb[18].mxu1  ;;  %v2906_v1 = vld [vmem:[#allocation10 + $0x20] sm:$0xff]  }
 0x170   :  { %v812_v7 = vmax.f32 %v792_v3, 0.0  ;;  %v795_v9 = vadd.f32 %v794_v6, %v3220_v24  ;;  %v2660_v10 = vpop.f32.mrb[19].mxu1  ;;  %v2860_v24 = vld [vmem:[#allocation8 + $0x268] sm:$0xff]   ;;  %v2909_v3 = vld [vmem:[#allocation10 + $0x38] sm:$0xff]  }
 0x171   :  { %2560 = vmatpush3.bf16.msra.mxu1 %v2850_v63  ;;  %2572 = vmatpush3.bf16.msra.mxu0 %v2851_v0  ;;  %v2903_v63 = vld [vmem:[#allocation10 + $0x8] sm:$0xff]   ;;  %v2905_v0 = vld [vmem:[#allocation10 + $0x18] sm:$0xff]  }
 0x172   :  { %2573 = vmatprep.subr.bf16.mxu0 %v2852_v14  ;;  %2589 = vmatprep.subr.bf16.mxu1 %v2853_v2  ;;  %v827_v16 = vmax.f32 %v795_v9, 0.0  ;;  %v2907_v14 = vld [vmem:[#allocation10 + $0x28] sm:$0xff]   ;;  %v2908_v2 = vld [vmem:[#allocation10 + $0x30] sm:$0xff]  }
 0x174   :  { %1966 = vmatmul.mubr.bf16.vlgmr.msra.gmra.mrb[24].mxu1 %v3268_v11  ;;  %v3290_v17 = vpack.c.bf16 %v827_v16, %v812_v7  ;;  %v2866_v11 = vld [vmem:[#allocation8 + $0x230] sm:$0xff]  }
 0x175   :  { %2574 = vmatpush3.bf16.msra.mxu0 %v2854_v8  ;;  %2590 = vmatpush3.bf16.msra.mxu1 %v2855_v12  ;;  %v2345_v12 = vld [vmem:[%s3342_s4] ss:$0 sm:$0xff] }
 0x176   :  { %2575 = vmatprep.subr.bf16.mxu0 %v2856_v13  ;;  %2591 = vmatprep.subr.bf16.mxu1 %v2857_v15 }
 0x177   :  { %2047 = vmatprep.mubr.bf16.mxu1 %v839_v60  ;;  %v2900_v60 = vld [vmem:[#allocation8 + $0x3b0] sm:$0xff]  }
 0x179   :  { %2576 = vmatpush3.bf16.msra.mxu0 %v2858_v18  ;;  %2592 = vmatpush3.bf16.msra.mxu1 %v2859_v19 }
 0x17a   :  { %2577 = vmatprep.subr.bf16.mxu0 %v2860_v24  ;;  %2593 = vmatprep.subr.bf16.mxu1 %v2861_v35 }
 0x17d   :  { %2578 = vmatpush3.bf16.msra.mxu0 %v2862_v20  ;;  %2594 = vmatpush3.bf16.msra.mxu1 %v2863_v39 }
 0x17e   :  { %2579 = vmatprep.subr.bf16.mxu0 %v2864_v28  ;;  %2595 = vmatprep.subr.bf16.mxu1 %v2865_v29 }
 0x181   :  { %2580 = vmatpush3.bf16.msra.mxu0 %v2866_v11  ;;  %2596 = vmatpush3.bf16.msra.mxu1 %v2867_v30 }
 0x182   :  { %2581 = vmatprep.subr.bf16.mxu0 %v2868_v31  ;;  %2597 = vmatprep.subr.bf16.mxu1 %v2869_v32 }
 0x185   :  { %2582 = vmatpush3.bf16.msra.mxu0 %v2870_v33  ;;  %2598 = vmatpush3.bf16.msra.mxu1 %v2871_v34 }
 0x186   :  { %2599 = vmatprep.subr.bf16.mxu1 %v2872_v36  ;;  %2611 = vmatprep.subr.bf16.mxu0 %v2873_v37 }
 0x188   :  { %2007 = vmatmul.mubr.bf16.vlgmr.msra.gmra.mrb[20].mxu0 %v3261_v4  ;;  %v2885_v4 = vld [vmem:[#allocation8 + $0x318] sm:$0xff]  }
 0x189   :  { %2600 = vmatpush3.bf16.msra.mxu1 %v2874_v42  ;;  %2612 = vmatpush3.bf16.msra.mxu0 %v2875_v38 }
 0x18a   :  { %2601 = vmatprep.subr.bf16.mxu1 %v2876_v40  ;;  %2613 = vmatprep.subr.bf16.mxu0 %v2877_v21 }
 0x18b   :  { %2088 = vmatprep.mubr.bf16.mxu0 %v3281_v26  ;;  %v2895_v26 = vld [vmem:[#allocation8 + $0x398] sm:$0xff]  }
 0x18d   :  { %2602 = vmatpush3.bf16.msra.mxu1 %v2878_v25  ;;  %2614 = vmatpush3.bf16.msra.mxu0 %v2879_v23 }
 0x18e   :  { %2603 = vmatprep.subr.bf16.mxu1 %v2880_v45  ;;  %2615 = vmatprep.subr.bf16.mxu0 %v2881_v41 }
 0x191   :  { %2604 = vmatpush3.bf16.msra.mxu1 %v2882_v43  ;;  %2616 = vmatpush3.bf16.msra.mxu0 %v2883_v44 }
 0x192   :  { %2617 = vmatprep.subr.bf16.mxu0 %v2884_v27  ;;  %2661 = vmatprep.subr.bf16.mxu1 %v3070_v50 }
 0x194   :  { %2048 = vmatmul.mubr.bf16.vlgmr.msra.gmra.mrb[28].mxu1 %v3284_v57  ;;  %v2897_v57 = vld [vmem:[#allocation8 + $0x338] sm:$0xff]  }
 0x195   :  { %2618 = vmatpush3.bf16.msra.mxu0 %v2885_v4  ;;  %2662 = vmatpush3.bf16.msra.mxu1 %v2886_v46 }
 0x196   :  { %2619 = vmatprep.subr.bf16.mxu0 %v2887_v47  ;;  %2663 = vmatprep.subr.bf16.mxu1 %v3070_v50 }
 0x197   :  { %2677 = vmatprep.mubr.msk.bf16.mxu1 %vm3071_vm1, %v3070_v50 }
 0x199   :  { %2620 = vmatpush3.bf16.msra.mxu0 %v2888_v48  ;;  %2664 = vmatpush3.bf16.msra.mxu1 %v2889_v49 }
 0x19a   :  { %2621 = vmatprep.subr.bf16.mxu0 %v2890_v51  ;;  %2665 = vmatprep.subr.bf16.mxu1 %v3070_v50 }
 0x19d   :  { %2622 = vmatpush3.bf16.msra.mxu0 %v2891_v52  ;;  %2666 = vmatpush3.bf16.msra.mxu1 %v2892_v53 }
 0x19e   :  { %2623 = vmatprep.subr.bf16.mxu0 %v2893_v54  ;;  %2667 = vmatprep.subr.bf16.mxu1 %v3070_v50 }
 0x1a1   :  { %2624 = vmatpush3.bf16.msra.mxu0 %v2894_v55  ;;  %2668 = vmatpush3.bf16.msra.mxu1 %v2895_v26 }
 0x1a2   :  { %2625 = vmatprep.subr.bf16.mxu0 %v2896_v56  ;;  %2669 = vmatprep.subr.bf16.mxu1 %v3070_v50 }
 0x1a5   :  { %2626 = vmatpush3.bf16.msra.mxu0 %v2897_v57  ;;  %2670 = vmatpush3.bf16.msra.mxu1 %v2898_v58 }
 0x1a6   :  { %2671 = vmatprep.subr.bf16.mxu1 %v3070_v50  ;;  %2681 = vmatprep.subr.bf16.mxu0 %v3070_v50 }
 0x1a8   :  { %2089 = vmatmul.mubr.bf16.vlgmr.msra.gmra.mrb[24].mxu0 %v3279_v22  ;;  %v2904_v22 = vld [vmem:[#allocation10 + $0x10] sm:$0xff]  }
 0x1a9   :  { %2672 = vmatpush3.bf16.msra.mxu1 %v2899_v59  ;;  %2697 = vmatprep.mubr.msk.bf16.mxu0 %vm3071_vm1, %v3070_v50 }
 0x1aa   :  { %2673 = vmatprep.subr.bf16.mxu1 %v3070_v50  ;;  %2682 = vmatpush3.bf16.msra.mxu0 %v2902_v62 }
 0x1ab   :  { %2683 = vmatprep.subr.bf16.mxu0 %v3070_v50 }
 0x1ad   :  { %2674 = vmatpush3.bf16.msra.mxu1 %v2900_v60 }
 0x1ae   :  { %2675 = vmatprep.subr.bf16.mxu1 %v3070_v50  ;;  %2684 = vmatpush3.bf16.msra.mxu0 %v2903_v63 }
 0x1af   :  { %2685 = vmatprep.subr.bf16.mxu0 %v3070_v50 }
 0x1b1   :  { %2676 = vmatpush3.bf16.msra.mxu1 %v2901_v61 }
 0x1b2   :  { %2686 = vmatpush3.bf16.msra.mxu0 %v2904_v22 }
 0x1b3   :  { %2687 = vmatprep.subr.bf16.mxu0 %v3070_v50 }
 0x1b4   :  { %2678 = vmatmul.mubr.bf16.vlgmr.msra.gmra.mrb[32].mxu1 %v3290_v17 }
 0x1b6   :  { %2688 = vmatpush3.bf16.msra.mxu0 %v2905_v0 }
 0x1b7   :  { %2689 = vmatprep.subr.bf16.mxu0 %v3070_v50 }
 0x1ba   :  { %2690 = vmatpush3.bf16.msra.mxu0 %v2906_v1 }
 0x1bb   :  { %2691 = vmatprep.subr.bf16.mxu0 %v3070_v50 }
 0x1be   :  { %2692 = vmatpush3.bf16.msra.mxu0 %v2907_v14 }
 0x1bf   :  { %2693 = vmatprep.subr.bf16.mxu0 %v3070_v50 }
 0x1c2   :  { %2694 = vmatpush3.bf16.msra.mxu0 %v2908_v2 }
 0x1c3   :  { %2695 = vmatprep.subr.bf16.mxu0 %v3070_v50 }
 0x1c6   :  { %2696 = vmatpush3.bf16.msra.mxu0 %v2909_v3 }
 0x21b   :  { %v2495_v5 = vpop.f32.mrb[12].mxu0 }
 0x21c   :  { %v2496_v6 = vpop.f32.mrb[13].mxu0 }
 0x21d   :  { %v2497_v7 = vadd.f32 %v2496_v6, %v2495_v5  ;;  %v2498_v9 = vpop.f32.mrb[14].mxu0 }
 0x21e   :  { %v2499_v10 = vpop.f32.mrb[15].mxu0 }
 0x21f   :  { %v2500_v8 = vadd.f32 %v2499_v10, %v2498_v9  ;;  %v1845_v16 = vadd.f32 %v2497_v7, %v2345_v12  ;;  %v2466_v7 = vld [vmem:[%s3344_s6] ss:$0 sm:$0xff]  ;;  %s3072_s6 = smov [#allocation11]  }
 0x220   :  { %s2278_s20 = sshll.u32 %s3072_s6, 4  ;;  %s2279_s20 = int_to_ptr.vmem [resolvable:$true] %s2278_s20 }
 0x221   :  { %v1848_v24 = vadd.f32 %v2500_v8, %v2345_v12  ;;  %s3028_s21 = scalar_lea.vmem %s2279_s20, 256  ;;  %p3033_p13 = scmp.lt.s32.totalorder %s2279_s20, %s2279_s20 }
 0x222   :  { %p3029_p12 = scmp.ne.s32.totalorder %s2279_s20, %s3028_s21  ;;  %p3034_p0 = scmp.lt.s32.totalorder %s3028_s21, %s3028_s21 }
 0x224   :  { %p3035_p1 = por %p3034_p0, %p3033_p13 }
 0x226   :  { %p3036_p2 = pnand %p3035_p1, %p3029_p12 }
 0x227   :  { %v2517_v13 = vpop.f32.mrb[20].mxu1 }
 0x228   :  { %v2518_v15 = vpop.f32.mrb[21].mxu1 }
 0x229   :  { %v2519_v17 = vadd.f32 %v2518_v15, %v2517_v13  ;;  %v2520_v18 = vpop.f32.mrb[22].mxu1 }
 0x22a   :  { %v2521_v19 = vpop.f32.mrb[23].mxu1 }
 0x22b   :  { %v1886_v50 = vadd.f32 %v2519_v17, %v1845_v16  ;;  %v2522_v35 = vadd.f32 %v2521_v19, %v2520_v18 }
 0x22d   :  { %v1889_v20 = vadd.f32 %v2522_v35, %v1848_v24 }
 0x23b   :  { %v2539_v39 = vpop.f32.mrb[16].mxu0 }
 0x23c   :  { %v2540_v28 = vpop.f32.mrb[17].mxu0 }
 0x23d   :  { %v2541_v29 = vadd.f32 %v2540_v28, %v2539_v39  ;;  %v2542_v11 = vpop.f32.mrb[18].mxu0 }
 0x23e   :  { %v2543_v30 = vpop.f32.mrb[19].mxu0 }
 0x23f   :  { %v1927_v31 = vadd.f32 %v2541_v29, %v1886_v50  ;;  %v2544_v32 = vadd.f32 %v2543_v30, %v2542_v11 }
 0x241   :  { %v1930_v33 = vadd.f32 %v2544_v32, %v1889_v20 }
 0x247   :  { %v2561_v34 = vpop.f32.mrb[24].mxu1 }
 0x248   :  { %v2562_v36 = vpop.f32.mrb[25].mxu1 }
 0x249   :  { %v2563_v37 = vadd.f32 %v2562_v36, %v2561_v34  ;;  %v2564_v42 = vpop.f32.mrb[26].mxu1 }
 0x24a   :  { %v2565_v38 = vpop.f32.mrb[27].mxu1 }
 0x24b   :  { %v1968_v40 = vadd.f32 %v2563_v37, %v1927_v31  ;;  %v2566_v21 = vadd.f32 %v2565_v38, %v2564_v42 }
 0x24d   :  { %v1971_v25 = vadd.f32 %v2566_v21, %v1930_v33 }
 0x25b   :  { %v2583_v23 = vpop.f32.mrb[20].mxu0 }
 0x25c   :  { %v2584_v45 = vpop.f32.mrb[21].mxu0 }
 0x25d   :  { %v2585_v41 = vadd.f32 %v2584_v45, %v2583_v23  ;;  %v2586_v43 = vpop.f32.mrb[22].mxu0 }
 0x25e   :  { %v2587_v44 = vpop.f32.mrb[23].mxu0 }
 0x25f   :  { %v2009_v27 = vadd.f32 %v2585_v41, %v1968_v40  ;;  %v2588_v4 = vadd.f32 %v2587_v44, %v2586_v43 }
 0x261   :  { %v2012_v46 = vadd.f32 %v2588_v4, %v1971_v25 }
 0x267   :  { %v2605_v47 = vpop.f32.mrb[28].mxu1 }
 0x268   :  { %v2606_v48 = vpop.f32.mrb[29].mxu1 }
 0x269   :  { %v2607_v49 = vadd.f32 %v2606_v48, %v2605_v47  ;;  %v2608_v51 = vpop.f32.mrb[30].mxu1 }
 0x26a   :  { %v2609_v52 = vpop.f32.mrb[31].mxu1 }
 0x26b   :  { %v2050_v53 = vadd.f32 %v2607_v49, %v2009_v27  ;;  %v2610_v54 = vadd.f32 %v2609_v52, %v2608_v51 }
 0x26d   :  { %v2053_v55 = vadd.f32 %v2610_v54, %v2012_v46 }
 0x27b   :  { %v2627_v26 = vpop.f32.mrb[24].mxu0 }
 0x27c   :  { %v2628_v56 = vpop.f32.mrb[25].mxu0 }
 0x27d   :  { %v2629_v57 = vadd.f32 %v2628_v56, %v2627_v26  ;;  %v2630_v58 = vpop.f32.mrb[26].mxu0 }
 0x27e   :  { %v2631_v59 = vpop.f32.mrb[27].mxu0 }
 0x27f   :  { %v2632_v60 = vadd.f32 %v2631_v59, %v2630_v58  ;;  %v2091_v61 = vadd.f32 %v2629_v57, %v2050_v53 }
 0x281   :  { %v2094_v62 = vadd.f32 %v2632_v60, %v2053_v55 }
 0x287   :  { %v2131_v63 = vpop.f32.mrb[32].mxu1 }
 0x288   :  { %v2132_v22 = vadd.f32 %v2131_v63, %v2091_v61  ;;  %v2679_v0 = vpop.f32.mrb[33].mxu1 }
 0x289   :  { %v2134_v1 = vpop.f32.mrb[34].mxu1 }
 0x28a   :  { %v2135_v14 = vadd.f32 %v2134_v1, %v2094_v62  ;;  %v2680_v2 = vpop.f32.mrb[35].mxu1  ;;  %v2138_v3 = vmax.f32 %v2132_v22, 0.0 }
 0x28c   :  { %v2139_v5 = vmax.f32 %v2135_v14, 0.0 }
 0x28e   :  { %v2140_v6 = vpack.c.bf16 %v2139_v5, %v2138_v3 }
 0x290   :  { %2698 = vmatmul.mubr.bf16.vlgmr.msra.gmra.mrb[28].mxu0 %v2140_v6 }
 0x363   :  { %v2246_v9 = vpop.f32.mrb[28].mxu0 }
 0x364   :  { %v2247_v10 = vadd.f32 %v2466_v7, %v2246_v9  ;;  %v2699_v8 = vpop.f32.mrb[29].mxu0 }
 0x365   :  { %v2249_v12 = vpop.f32.mrb[30].mxu0 }
 0x366   :  { %2253 = vmax.xlane.f32.xlu0 %v2247_v10  ;;  %v2700_v13 = vpop.f32.mrb[31].mxu0  ;;  %v2250_v15 = vadd.f32 %v2466_v7, %v2249_v12 }
 0x36a   :  { %2255 = vmax.xlane.f32.xlu0 %v2250_v15 }
 0x3f3   :  { %v2254_v16 = vpop.xlane.xlu0 %2253 }
 0x3f4   :  { %v2257_v17 = vsub.f32 %v2247_v10, %v2254_v16 }
 0x3f6   :  { %v2259_v18 = vmul.f32 1.442695, %v2257_v17 }
 0x3f7   :  { %v2256_v19 = vpop.xlane.xlu0 %2255 }
 0x3f8   :  { %2910 = vpow2.f32 %v2259_v18  ;;  %v2258_v24 = vsub.f32 %v2250_v15, %v2256_v19 }
 0x3fa   :  { %v2261_v50 = vmul.f32 1.442695, %v2258_v24 }
 0x3fc   :  { %2912 = vpow2.f32 %v2261_v50 }
 0x402   :  { %v2911_v35 = vpop.eup %2910 }
 0x403   :  { %2263 = vadd.xlane.f32.xlu1 %v2911_v35 }
 0x406   :  { %v2913_v20 = vpop.eup %2912 }
 0x407   :  { %2265 = vadd.xlane.f32.xlu1 %v2913_v20 }
 0x490   :  { %v2264_v39 = vpop.xlane.xlu1 %2263 }
 0x491   :  { %2914 = vrcp.f32 %v2264_v39 }
 0x494   :  { %v2266_v28 = vpop.xlane.xlu1 %2265 }
 0x495   :  { %2916 = vrcp.f32 %v2266_v28 }
 0x49b   :  { %v2915_v29 = vpop.eup %2914 }
 0x49c   :  { %v2268_v11 = vmul.f32 %v2915_v29, %v2911_v35 }
 0x49e   :  { %2271 = vst [vmem:[#allocation11] sm:$0xff] %v2268_v11 }
 0x49f   :  { %v2917_v30 = vpop.eup %2916 }
 0x4a0   :  { %v2270_v31 = vmul.f32 %v2917_v30, %v2913_v20 }
 0x4a2   :  { %2272 = vst [vmem:[#allocation11 + $0x8] sm:$0xff] %v2270_v31 }
 0x4a3   :  { %3039 = shalt.err (!%p3036_p2)
}
 0x4a4   :  { %s3040_s24 = scalar_lea.hbm %s3345_s7, 256 }
 0x4a5   :  { %p3041_p3 = scmp.ne.s32.totalorder %s3345_s7, %s3040_s24  ;;  %p3044_p4 = scmp.lt.u32.totalorder %s3040_s24, %s3345_s7 }
 0x4a7   :  { %p3046_p5 = pnand %p3044_p4, %p3041_p3 }
 0x4a9   :  { %3049 = shalt.err (!%p3046_p5)
}
 0x4aa   :  { %2284 = dma.vmem_to_hbm [thread:$0]  %s2279_s20, 256, %s3345_s7, [#allocation4], %s3065_s3, %s3065_s3, %s3066_s15  }
 0x4ab   :  { %3056 = dma.done.wait [#allocation4], 256  }
 0x4ac   :  { %3057 = vsyncadd [#allocation4], 4294967040 }
 0x4ad   :  { %2288 = vsyncpa [#allocation3], 1 }
 0x4ae   :  { %2289 = vsyncpa [#allocation6], 1 }
 0x4af   :  { %2290 = vsyncpa [#allocation9], 1 }
 0x4b0   :  { %2291 = vsyncpa [#allocation4], 1 }

</bundles_post_ra>
